<compile_context>
chip_gen: v5e
topology: v5e:2x2
jax: 0.10.0
libtpu: 0.0.40
codegen_flags: <defaults>
</compile_context>

<pallas_src>
import math
import functools

import jax
import jax.numpy as jnp
from jax.experimental import pallas as pl
from jax.experimental.pallas import tpu as pltpu


def _spubert_attention_kernel(
    x_ref, mask_ref,
    wqkv_ref, bqkv_ref, wo_ref, bo_ref, gamma_ref, beta_ref,
    out_ref,
    qkv_ref, ctx_ref,
    *, batch_block: int, seq_len: int, num_heads: int, head_dim: int,
    heads_per_group: int, eps: float,
):
    H = num_heads * head_dim
    S = seq_len
    dh = head_dim
    hpg = heads_per_group
    gw = hpg * dh                       # lane width of one head group (128 for BERT dh=64)
    n_groups = num_heads // hpg

    # --- Fused Q/K/V projection: one MXU matmul with N = 3H, bf16 operands / f32 accumulation.
    # Result goes straight into a bf16 VMEM scratch slab so it is not a huge live jnp value
    # across the attention loop (1/sqrt(dh) is pre-folded into the Q weights on the host).
    x_bf = x_ref[...].astype(jnp.bfloat16)
    qkv = jnp.dot(x_bf, wqkv_ref[...], preferred_element_type=jnp.float32)
    qkv_ref[...] = (qkv + bqkv_ref[...]).astype(jnp.bfloat16)          # (rows, 3H)

    def batch_body(b):
        r0 = b * S
        if not isinstance(r0, int):
            r0 = pl.multiple_of(r0, S)
        row = pl.ds(r0, S)
        # (1, S) additive mask row; the VPU broadcasts it across sublanes in the add,
        # no (S, S) f32 mask is ever materialized.
        mask_row = mask_ref[b]
        for g in range(n_groups):
            ctx_heads = []
            for hh in range(hpg):
                c0 = (g * hpg + hh) * dh
                qh = qkv_ref[row, c0:c0 + dh]                           # (S, dh) bf16
                kh = qkv_ref[row, H + c0:H + c0 + dh]                   # (S, dh) bf16
                vh = qkv_ref[row, 2 * H + c0:2 * H + c0 + dh]           # (S, dh) bf16

                # scores = q . k^T without materializing a transpose (contract dim 1 of both).
                scores = jnp.einsum('qd,kd->qk', qh, kh,
                                    preferred_element_type=jnp.float32)
                scores = scores + mask_row                              # (S,S) + (1,S)
                m = jnp.max(scores, axis=-1, keepdims=True)
                e = jnp.exp(scores - m)
                l = jnp.sum(e, axis=-1, keepdims=True)
                p = (e * pl.reciprocal(l, approx=True)).astype(jnp.bfloat16)

                # dropout(attention_probs) -> identity (eval mode)
                ctx_heads.append(
                    jnp.dot(p, vh,
                            preferred_element_type=jnp.float32).astype(jnp.bfloat16))
            ctx_grp = ctx_heads[0] if hpg == 1 else jnp.concatenate(ctx_heads, axis=-1)
            # One lane-dense (S, gw) store per head group.
            ctx_ref[row, g * gw:(g + 1) * gw] = ctx_grp

    if batch_block <= 2:
        for b in range(batch_block):          # static unroll: LLO sees the full schedule
            batch_body(b)
    else:
        def _body(b, carry):
            batch_body(b)
            return carry
        jax.lax.fori_loop(0, batch_block, _body, 0)

    # --- SPUBERTSelfOutput: dense + (dropout: identity) + residual + LayerNorm ---
    out = jnp.dot(ctx_ref[...], wo_ref[...],
                  preferred_element_type=jnp.float32) + bo_ref[...]
    y = out + x_ref[...]                      # residual re-read: x_ref is already in VMEM
    mean = jnp.sum(y, axis=-1, keepdims=True) * (1.0 / H)
    yc = y - mean
    var = jnp.sum(yc * yc, axis=-1, keepdims=True) * (1.0 / H)
    yn = yc * jax.lax.rsqrt(var + eps)
    out_ref[...] = (yn * gamma_ref[...] + beta_ref[...]).astype(out_ref.dtype)


def _vmem_limit_bytes(rows, S, H, bt):
    """Conservative VMEM budget: double-buffered x/out/mask/weights + single scratch."""
    f32, b16 = 4, 2
    x_blk = rows * H * f32
    out_blk = rows * H * f32
    mask_blk = bt * S * f32
    weights = H * 3 * H * b16 + 3 * H * f32 + H * H * b16 + 3 * H * f32
    scratch = rows * 3 * H * b16 + rows * H * b16
    need = 2 * (x_blk + out_blk + mask_blk + weights) + scratch
    # 1.5x headroom for compiler-internal scratch; clamp to [32 MiB, 64 MiB] so the limit
    # is valid on every generation (v7x only has 64 MiB of physical VMEM per TensorCore).
    return int(min(max(32 * 1024 * 1024, need * 3 // 2), 64 * 1024 * 1024))


def spubert_attention(x, attn_mask, params, *, num_heads: int, eps: float = 1e-12,
                      batch_block: int | None = None):
    """x: (B, S, H) float32. attn_mask: (B, 1, S) additive mask. Returns (B, S, H)."""
    B, S, H = x.shape
    head_dim = H // num_heads
    (wq, bq, wk, bk, wv, bv, wo, bo, gamma, beta) = params

    # Host-side packing: fused QKV weight / bias with the attention scale folded into the
    # Q columns; weights in bf16 (f32 accumulation in-kernel).
    scale = 1.0 / math.sqrt(head_dim)
    wqkv = jnp.concatenate([wq * scale, wk, wv], axis=1).astype(jnp.bfloat16)  # (H, 3H)
    bqkv = jnp.concatenate([bq * scale, bk, bv], axis=1).astype(jnp.float32)   # (1, 3H)
    wo_bf = wo.astype(jnp.bfloat16)

    # Batch folding: target 256-512 rows per grid step (amortize per-step overhead, feed the
    # MXU a larger M), while keeping grid >= 2 so v7x's two TensorCores both get work.
    if batch_block is None:
        if S % 8 == 0:
            target_rows = 512
            bt = max(1, min(B, max(1, target_rows // S)))
            while B % bt:
                bt -= 1
            if B >= 2:
                while bt > 1 and (B // bt) < 2:
                    bt = max(1, bt // 2)
                    while B % bt:
                        bt -= 1
        else:
            bt = B
    else:
        bt = batch_block
    assert B % bt == 0, "batch_block must divide batch size"

    # Lane-dense head groups: smallest multiple of head_dim reaching 128 lanes (pairs for
    # BERT's head_dim=64); at tiny H the group is simply all heads.
    hpg = max(1, min(num_heads, 128 // max(head_dim, 1)))
    while num_heads % hpg:
        hpg -= 1

    rows = bt * S
    grid = (B // bt,)
    x2 = x.reshape(B * S, H)           # free host-side reshape -> lane-dense 2-D blocks

    kernel = functools.partial(
        _spubert_attention_kernel,
        batch_block=bt, seq_len=S, num_heads=num_heads, head_dim=head_dim,
        heads_per_group=hpg, eps=eps,
    )

    out2 = pl.pallas_call(
        kernel,
        out_shape=jax.ShapeDtypeStruct((B * S, H), x.dtype),
        grid_spec=pltpu.PrefetchScalarGridSpec(
            num_scalar_prefetch=0,
            grid=grid,
            in_specs=[
                pl.BlockSpec((rows, H), lambda i: (i, 0)),        # hidden states (flattened)
                pl.BlockSpec((bt, 1, S), lambda i: (i, 0, 0)),    # additive attention mask
                pl.BlockSpec((H, 3 * H), lambda i: (0, 0)),       # fused Wqkv (bf16, Q scaled)
                pl.BlockSpec((1, 3 * H), lambda i: (0, 0)),       # fused bias (f32, Q scaled)
                pl.BlockSpec((H, H), lambda i: (0, 0)),           # Wo (bf16)
                pl.BlockSpec((1, H), lambda i: (0, 0)),           # bo
                pl.BlockSpec((1, H), lambda i: (0, 0)),           # LayerNorm gamma
                pl.BlockSpec((1, H), lambda i: (0, 0)),           # LayerNorm beta
            ],
            out_specs=pl.BlockSpec((rows, H), lambda i: (i, 0)),
            scratch_shapes=[
                pltpu.VMEM((rows, 3 * H), jnp.bfloat16),          # fused QKV slab
                pltpu.VMEM((rows, H), jnp.bfloat16),              # per-head context slab
            ],
        ),
        compiler_params=pltpu.CompilerParams(
            dimension_semantics=("parallel",),
            vmem_limit_bytes=_vmem_limit_bytes(rows, S, H, bt),
        ),
    )(x2, attn_mask, wqkv, bqkv, wo_bf, bo, gamma, beta)

    return out2.reshape(B, S, H)


def _reference(x, attn_mask, params, *, num_heads: int, eps: float = 1e-12):
    """Pure-JAX reference of SPUBERTAttention.forward (eval mode), mirroring the kernel's
    bf16-operand / f32-accumulation matmuls and the host-side scale folding so tolerances
    stay tight."""
    (wq, bq, wk, bk, wv, bv, wo, bo, gamma, beta) = params
    B, S, H = x.shape
    dh = H // num_heads
    bf = jnp.bfloat16
    scale = 1.0 / math.sqrt(dh)

    def mm(a, b):
        return jnp.dot(a.astype(bf), b.astype(bf), preferred_element_type=jnp.float32)

    x2 = x.reshape(B * S, H)

    def heads(t):  # (B*S, H) -> (B, nh, S, dh)
        return t.reshape(B, S, num_heads, dh).transpose(0, 2, 1, 3)

    q = heads((mm(x2, wq * scale) + bq * scale).astype(bf))   # scale folded, as in the kernel
    k = heads((mm(x2, wk) + bk).astype(bf))
    v = heads((mm(x2, wv) + bv).astype(bf))

    scores = jnp.einsum('bhqd,bhkd->bhqk', q, k, preferred_element_type=jnp.float32)
    scores = scores + attn_mask[:, None, :, :]          # (B,1,1,S) broadcast
    probs = jax.nn.softmax(scores, axis=-1).astype(bf)
    ctx = jnp.einsum('bhqk,bhkd->bhqd', probs, v, preferred_element_type=jnp.float32)
    ctx = ctx.transpose(0, 2, 1, 3).reshape(B * S, H)

    out = mm(ctx, wo) + bo
    y = out + x2
    mean = jnp.mean(y, axis=-1, keepdims=True)
    var = jnp.mean((y - mean) ** 2, axis=-1, keepdims=True)
    yn = (y - mean) * jax.lax.rsqrt(var + eps)
    return (yn * gamma + beta).reshape(B, S, H)


if __name__ == "__main__":
    # Small config consistent with the module: hidden_size=32, num_head=4, seq=8, batch=2.
    B, S, H = 2, 8, 32
    NUM_HEADS = 4
    EPS = 1e-12

    key = jax.random.PRNGKey(0)
    keys = jax.random.split(key, 8)

    x = jax.random.normal(keys[0], (B, S, H), dtype=jnp.float32)

    def lin_w(k):  # [in, out] layout so the kernel does x @ W (== PyTorch x @ W_pt.T)
        return 0.02 * jax.random.normal(k, (H, H), dtype=jnp.float32)

    wq, wk, wv, wo = lin_w(keys[1]), lin_w(keys[2]), lin_w(keys[3]), lin_w(keys[4])
    bq = 0.01 * jax.random.normal(keys[5], (1, H), dtype=jnp.float32)
    bk = jnp.zeros((1, H), jnp.float32)
    bv = 0.01 * jax.random.normal(keys[6], (1, H), dtype=jnp.float32)
    bo = 0.01 * jax.random.normal(keys[7], (1, H), dtype=jnp.float32)
    gamma = jnp.ones((1, H), jnp.float32)
    beta = jnp.zeros((1, H), jnp.float32)
    params = (wq, bq, wk, bk, wv, bv, wo, bo, gamma, beta)

    # Additive attention mask (B, 1, S): mask out the last 2 key positions of batch 1.
    attn_mask = jnp.zeros((B, 1, S), jnp.float32)
    attn_mask = attn_mask.at[1, 0, -2:].set(-10000.0)

    out = spubert_attention(x, attn_mask, params, num_heads=NUM_HEADS, eps=EPS)
    out = jax.block_until_ready(out)

    ref = _reference(x, attn_mask, params, num_heads=NUM_HEADS, eps=EPS)
    assert out.shape == (B, S, H)
    # Tolerance accounts for approx-reciprocal softmax; bf16 operand casts and the
    # scale-folding are mirrored by the reference so the comparison remains meaningful.
    assert jnp.allclose(out, ref, atol=2e-3, rtol=2e-3), "mismatch vs reference"

    print("KERNEL_OK")
</pallas_src>

<mosaic_0001>
module attributes {stable_mosaic.version = 11 : i64} {
  func.func @_spubert_attention_kernel(%arg0: i32, %arg1: memref<8x32xf32, #tpu.memory_space<vmem>>, %arg2: memref<1x1x8xf32, #tpu.memory_space<vmem>>, %arg3: memref<32x96xbf16, #tpu.memory_space<vmem>>, %arg4: memref<1x96xf32, #tpu.memory_space<vmem>>, %arg5: memref<32x32xbf16, #tpu.memory_space<vmem>>, %arg6: memref<1x32xf32, #tpu.memory_space<vmem>>, %arg7: memref<1x32xf32, #tpu.memory_space<vmem>>, %arg8: memref<1x32xf32, #tpu.memory_space<vmem>>, %arg9: memref<8x32xf32, #tpu.memory_space<vmem>>, %arg10: memref<8x96xbf16, #tpu.memory_space<vmem>>, %arg11: memref<8x32xbf16, #tpu.memory_space<vmem>>) attributes {dimension_semantics = [#tpu.dimension_semantics<parallel>], iteration_bounds = array<i64: 2>, scalar_prefetch = 0 : i64, scratch_operands = 2 : i64, tpu.core_type = #tpu.core_type<tc>, window_params = [{transform_indices = @transform_0, window_bounds = array<i64: 8, 32>}, {transform_indices = @transform_1, window_bounds = array<i64: 1, 1, 8>}, {pipeline_mode = #tpu.pipeline_mode<synchronous>, transform_indices = @transform_2, window_bounds = array<i64: 32, 96>}, {pipeline_mode = #tpu.pipeline_mode<synchronous>, transform_indices = @transform_3, window_bounds = array<i64: 1, 96>}, {pipeline_mode = #tpu.pipeline_mode<synchronous>, transform_indices = @transform_4, window_bounds = array<i64: 32, 32>}, {pipeline_mode = #tpu.pipeline_mode<synchronous>, transform_indices = @transform_5, window_bounds = array<i64: 1, 32>}, {pipeline_mode = #tpu.pipeline_mode<synchronous>, transform_indices = @transform_6, window_bounds = array<i64: 1, 32>}, {pipeline_mode = #tpu.pipeline_mode<synchronous>, transform_indices = @transform_7, window_bounds = array<i64: 1, 32>}, {transform_indices = @transform_8, window_bounds = array<i64: 8, 32>}]} {
    %c0 = arith.constant 0 : index
    %c0_0 = arith.constant 0 : index
    %0 = vector.load %arg1[%c0, %c0_0] : memref<8x32xf32, #tpu.memory_space<vmem>>, vector<8x32xf32>
    %1 = arith.truncf %0 : vector<8x32xf32> to vector<8x32xbf16>
    %c0_1 = arith.constant 0 : index
    %c0_2 = arith.constant 0 : index
    %2 = vector.load %arg3[%c0_1, %c0_2] : memref<32x96xbf16, #tpu.memory_space<vmem>>, vector<32x96xbf16>
    %cst = arith.constant dense<0.000000e+00> : vector<8x96xf32>
    %3 = tpu.matmul %1, %2, %cst {dimension_numbers = #tpu.dot_dimension_numbers<[1], [0], [0], [1], [0, 0, 1, 1], [], []>} : vector<8x32xbf16>, vector<32x96xbf16>, vector<8x96xf32> -> vector<8x96xf32>
    %c0_3 = arith.constant 0 : index
    %c0_4 = arith.constant 0 : index
    %4 = vector.load %arg4[%c0_3, %c0_4] : memref<1x96xf32, #tpu.memory_space<vmem>>, vector<1x96xf32>
    %5 = vector.broadcast %4 : vector<1x96xf32> to vector<8x96xf32>
    %6 = arith.addf %3, %5 : vector<8x96xf32>
    %7 = arith.truncf %6 : vector<8x96xf32> to vector<8x96xbf16>
    %c0_5 = arith.constant 0 : index
    %c0_6 = arith.constant 0 : index
    %8 = vector.load %arg10[%c0_5, %c0_6] : memref<8x96xbf16, #tpu.memory_space<vmem>>, vector<8x96xbf16>
    tpu.vector_store %arg10[%c0_5, %c0_6], %7 {strides = array<i32>} : memref<8x96xbf16, #tpu.memory_space<vmem>>, vector<8x96xbf16>,
    %c0_7 = arith.constant 0 : index
    %c0_8 = arith.constant 0 : index
    %c0_9 = arith.constant 0 : index
    %9 = vector.load %arg2[%c0_7, %c0_8, %c0_9] : memref<1x1x8xf32, #tpu.memory_space<vmem>>, vector<1x1x8xf32>
    %10 = vector.shape_cast %9 : vector<1x1x8xf32> to vector<1x8xf32>
    %c0_10 = arith.constant 0 : index
    %c0_11 = arith.constant 0 : index
    %11 = vector.load %arg10[%c0_10, %c0_11] : memref<8x96xbf16, #tpu.memory_space<vmem>>, vector<8x8xbf16>
    %c0_12 = arith.constant 0 : index
    %c32 = arith.constant 32 : index
    %12 = vector.load %arg10[%c0_12, %c32] : memref<8x96xbf16, #tpu.memory_space<vmem>>, vector<8x8xbf16>
    %c0_13 = arith.constant 0 : index
    %c64 = arith.constant 64 : index
    %13 = vector.load %arg10[%c0_13, %c64] : memref<8x96xbf16, #tpu.memory_space<vmem>>, vector<8x8xbf16>
    "tpu.trace_start"() <{level = 10 : i32, message = "qd,kd->qk"}> : () -> ()
    %cst_14 = arith.constant dense<0.000000e+00> : vector<8x8xf32>
    %14 = tpu.matmul %11, %12, %cst_14 {dimension_numbers = #tpu.dot_dimension_numbers<[1], [1], [0], [0], [0, 0, 1, 0], [], []>} : vector<8x8xbf16>, vector<8x8xbf16>, vector<8x8xf32> -> vector<8x8xf32>
    "tpu.trace_stop"() : () -> ()
    %15 = vector.broadcast %10 : vector<1x8xf32> to vector<8x8xf32>
    %16 = arith.addf %14, %15 : vector<8x8xf32>
    %cst_15 = arith.constant dense<0xFF800000> : vector<8xf32>
    %17 = vector.multi_reduction <maximumf>, %16, %cst_15 [1] : vector<8x8xf32> to vector<8xf32>
    %18 = vector.shape_cast %17 : vector<8xf32> to vector<8x1xf32>
    %19 = vector.broadcast %18 : vector<8x1xf32> to vector<8x8xf32>
    %20 = arith.subf %16, %19 : vector<8x8xf32>
    %21 = math.exp %20 : vector<8x8xf32>
    %cst_16 = arith.constant dense<0.000000e+00> : vector<8xf32>
    %22 = vector.multi_reduction <add>, %21, %cst_16 [1] : vector<8x8xf32> to vector<8xf32>
    %23 = vector.shape_cast %22 : vector<8xf32> to vector<8x1xf32>
    %24 = tpu.reciprocal %23 {approx = true} : vector<8x1xf32> -> vector<8x1xf32>
    %25 = vector.broadcast %24 : vector<8x1xf32> to vector<8x8xf32>
    %26 = arith.mulf %21, %25 : vector<8x8xf32>
    %27 = arith.truncf %26 : vector<8x8xf32> to vector<8x8xbf16>
    %cst_17 = arith.constant dense<0.000000e+00> : vector<8x8xf32>
    %28 = tpu.matmul %27, %13, %cst_17 {dimension_numbers = #tpu.dot_dimension_numbers<[1], [0], [0], [1], [0, 0, 1, 1], [], []>} : vector<8x8xbf16>, vector<8x8xbf16>, vector<8x8xf32> -> vector<8x8xf32>
    %29 = arith.truncf %28 : vector<8x8xf32> to vector<8x8xbf16>
    %c0_18 = arith.constant 0 : index
    %c8 = arith.constant 8 : index
    %30 = vector.load %arg10[%c0_18, %c8] : memref<8x96xbf16, #tpu.memory_space<vmem>>, vector<8x8xbf16>
    %c0_19 = arith.constant 0 : index
    %c40 = arith.constant 40 : index
    %31 = vector.load %arg10[%c0_19, %c40] : memref<8x96xbf16, #tpu.memory_space<vmem>>, vector<8x8xbf16>
    %c0_20 = arith.constant 0 : index
    %c72 = arith.constant 72 : index
    %32 = vector.load %arg10[%c0_20, %c72] : memref<8x96xbf16, #tpu.memory_space<vmem>>, vector<8x8xbf16>
    "tpu.trace_start"() <{level = 10 : i32, message = "qd,kd->qk"}> : () -> ()
    %cst_21 = arith.constant dense<0.000000e+00> : vector<8x8xf32>
    %33 = tpu.matmul %30, %31, %cst_21 {dimension_numbers = #tpu.dot_dimension_numbers<[1], [1], [0], [0], [0, 0, 1, 0], [], []>} : vector<8x8xbf16>, vector<8x8xbf16>, vector<8x8xf32> -> vector<8x8xf32>
    "tpu.trace_stop"() : () -> ()
    %34 = vector.broadcast %10 : vector<1x8xf32> to vector<8x8xf32>
    %35 = arith.addf %33, %34 : vector<8x8xf32>
    %cst_22 = arith.constant dense<0xFF800000> : vector<8xf32>
    %36 = vector.multi_reduction <maximumf>, %35, %cst_22 [1] : vector<8x8xf32> to vector<8xf32>
    %37 = vector.shape_cast %36 : vector<8xf32> to vector<8x1xf32>
    %38 = vector.broadcast %37 : vector<8x1xf32> to vector<8x8xf32>
    %39 = arith.subf %35, %38 : vector<8x8xf32>
    %40 = math.exp %39 : vector<8x8xf32>
    %cst_23 = arith.constant dense<0.000000e+00> : vector<8xf32>
    %41 = vector.multi_reduction <add>, %40, %cst_23 [1] : vector<8x8xf32> to vector<8xf32>
    %42 = vector.shape_cast %41 : vector<8xf32> to vector<8x1xf32>
    %43 = tpu.reciprocal %42 {approx = true} : vector<8x1xf32> -> vector<8x1xf32>
    %44 = vector.broadcast %43 : vector<8x1xf32> to vector<8x8xf32>
    %45 = arith.mulf %40, %44 : vector<8x8xf32>
    %46 = arith.truncf %45 : vector<8x8xf32> to vector<8x8xbf16>
    %cst_24 = arith.constant dense<0.000000e+00> : vector<8x8xf32>
    %47 = tpu.matmul %46, %32, %cst_24 {dimension_numbers = #tpu.dot_dimension_numbers<[1], [0], [0], [1], [0, 0, 1, 1], [], []>} : vector<8x8xbf16>, vector<8x8xbf16>, vector<8x8xf32> -> vector<8x8xf32>
    %48 = arith.truncf %47 : vector<8x8xf32> to vector<8x8xbf16>
    %c0_25 = arith.constant 0 : index
    %c16 = arith.constant 16 : index
    %49 = vector.load %arg10[%c0_25, %c16] : memref<8x96xbf16, #tpu.memory_space<vmem>>, vector<8x8xbf16>
    %c0_26 = arith.constant 0 : index
    %c48 = arith.constant 48 : index
    %50 = vector.load %arg10[%c0_26, %c48] : memref<8x96xbf16, #tpu.memory_space<vmem>>, vector<8x8xbf16>
    %c0_27 = arith.constant 0 : index
    %c80 = arith.constant 80 : index
    %51 = vector.load %arg10[%c0_27, %c80] : memref<8x96xbf16, #tpu.memory_space<vmem>>, vector<8x8xbf16>
    "tpu.trace_start"() <{level = 10 : i32, message = "qd,kd->qk"}> : () -> ()
    %cst_28 = arith.constant dense<0.000000e+00> : vector<8x8xf32>
    %52 = tpu.matmul %49, %50, %cst_28 {dimension_numbers = #tpu.dot_dimension_numbers<[1], [1], [0], [0], [0, 0, 1, 0], [], []>} : vector<8x8xbf16>, vector<8x8xbf16>, vector<8x8xf32> -> vector<8x8xf32>
    "tpu.trace_stop"() : () -> ()
    %53 = vector.broadcast %10 : vector<1x8xf32> to vector<8x8xf32>
    %54 = arith.addf %52, %53 : vector<8x8xf32>
    %cst_29 = arith.constant dense<0xFF800000> : vector<8xf32>
    %55 = vector.multi_reduction <maximumf>, %54, %cst_29 [1] : vector<8x8xf32> to vector<8xf32>
    %56 = vector.shape_cast %55 : vector<8xf32> to vector<8x1xf32>
    %57 = vector.broadcast %56 : vector<8x1xf32> to vector<8x8xf32>
    %58 = arith.subf %54, %57 : vector<8x8xf32>
    %59 = math.exp %58 : vector<8x8xf32>
    %cst_30 = arith.constant dense<0.000000e+00> : vector<8xf32>
    %60 = vector.multi_reduction <add>, %59, %cst_30 [1] : vector<8x8xf32> to vector<8xf32>
    %61 = vector.shape_cast %60 : vector<8xf32> to vector<8x1xf32>
    %62 = tpu.reciprocal %61 {approx = true} : vector<8x1xf32> -> vector<8x1xf32>
    %63 = vector.broadcast %62 : vector<8x1xf32> to vector<8x8xf32>
    %64 = arith.mulf %59, %63 : vector<8x8xf32>
    %65 = arith.truncf %64 : vector<8x8xf32> to vector<8x8xbf16>
    %cst_31 = arith.constant dense<0.000000e+00> : vector<8x8xf32>
    %66 = tpu.matmul %65, %51, %cst_31 {dimension_numbers = #tpu.dot_dimension_numbers<[1], [0], [0], [1], [0, 0, 1, 1], [], []>} : vector<8x8xbf16>, vector<8x8xbf16>, vector<8x8xf32> -> vector<8x8xf32>
    %67 = arith.truncf %66 : vector<8x8xf32> to vector<8x8xbf16>
    %c0_32 = arith.constant 0 : index
    %c24 = arith.constant 24 : index
    %68 = vector.load %arg10[%c0_32, %c24] : memref<8x96xbf16, #tpu.memory_space<vmem>>, vector<8x8xbf16>
    %c0_33 = arith.constant 0 : index
    %c56 = arith.constant 56 : index
    %69 = vector.load %arg10[%c0_33, %c56] : memref<8x96xbf16, #tpu.memory_space<vmem>>, vector<8x8xbf16>
    %c0_34 = arith.constant 0 : index
    %c88 = arith.constant 88 : index
    %70 = vector.load %arg10[%c0_34, %c88] : memref<8x96xbf16, #tpu.memory_space<vmem>>, vector<8x8xbf16>
    "tpu.trace_start"() <{level = 10 : i32, message = "qd,kd->qk"}> : () -> ()
    %cst_35 = arith.constant dense<0.000000e+00> : vector<8x8xf32>
    %71 = tpu.matmul %68, %69, %cst_35 {dimension_numbers = #tpu.dot_dimension_numbers<[1], [1], [0], [0], [0, 0, 1, 0], [], []>} : vector<8x8xbf16>, vector<8x8xbf16>, vector<8x8xf32> -> vector<8x8xf32>
    "tpu.trace_stop"() : () -> ()
    %72 = vector.broadcast %10 : vector<1x8xf32> to vector<8x8xf32>
    %73 = arith.addf %71, %72 : vector<8x8xf32>
    %cst_36 = arith.constant dense<0xFF800000> : vector<8xf32>
    %74 = vector.multi_reduction <maximumf>, %73, %cst_36 [1] : vector<8x8xf32> to vector<8xf32>
    %75 = vector.shape_cast %74 : vector<8xf32> to vector<8x1xf32>
    %76 = vector.broadcast %75 : vector<8x1xf32> to vector<8x8xf32>
    %77 = arith.subf %73, %76 : vector<8x8xf32>
    %78 = math.exp %77 : vector<8x8xf32>
    %cst_37 = arith.constant dense<0.000000e+00> : vector<8xf32>
    %79 = vector.multi_reduction <add>, %78, %cst_37 [1] : vector<8x8xf32> to vector<8xf32>
    %80 = vector.shape_cast %79 : vector<8xf32> to vector<8x1xf32>
    %81 = tpu.reciprocal %80 {approx = true} : vector<8x1xf32> -> vector<8x1xf32>
    %82 = vector.broadcast %81 : vector<8x1xf32> to vector<8x8xf32>
    %83 = arith.mulf %78, %82 : vector<8x8xf32>
    %84 = arith.truncf %83 : vector<8x8xf32> to vector<8x8xbf16>
    %cst_38 = arith.constant dense<0.000000e+00> : vector<8x8xf32>
    %85 = tpu.matmul %84, %70, %cst_38 {dimension_numbers = #tpu.dot_dimension_numbers<[1], [0], [0], [1], [0, 0, 1, 1], [], []>} : vector<8x8xbf16>, vector<8x8xbf16>, vector<8x8xf32> -> vector<8x8xf32>
    %86 = arith.truncf %85 : vector<8x8xf32> to vector<8x8xbf16>
    %87 = tpu.concatenate %29, %48, %67, %86 in 1 : vector<8x8xbf16>, vector<8x8xbf16>, vector<8x8xbf16>, vector<8x8xbf16> -> vector<8x32xbf16>
    %c0_39 = arith.constant 0 : index
    %c0_40 = arith.constant 0 : index
    %88 = vector.load %arg11[%c0_39, %c0_40] : memref<8x32xbf16, #tpu.memory_space<vmem>>, vector<8x32xbf16>
    tpu.vector_store %arg11[%c0_39, %c0_40], %87 {strides = array<i32>} : memref<8x32xbf16, #tpu.memory_space<vmem>>, vector<8x32xbf16>,
    %c0_41 = arith.constant 0 : index
    %c0_42 = arith.constant 0 : index
    %89 = vector.load %arg11[%c0_41, %c0_42] : memref<8x32xbf16, #tpu.memory_space<vmem>>, vector<8x32xbf16>
    %c0_43 = arith.constant 0 : index
    %c0_44 = arith.constant 0 : index
    %90 = vector.load %arg5[%c0_43, %c0_44] : memref<32x32xbf16, #tpu.memory_space<vmem>>, vector<32x32xbf16>
    %cst_45 = arith.constant dense<0.000000e+00> : vector<8x32xf32>
    %91 = tpu.matmul %89, %90, %cst_45 {dimension_numbers = #tpu.dot_dimension_numbers<[1], [0], [0], [1], [0, 0, 1, 1], [], []>} : vector<8x32xbf16>, vector<32x32xbf16>, vector<8x32xf32> -> vector<8x32xf32>
    %c0_46 = arith.constant 0 : index
    %c0_47 = arith.constant 0 : index
    %92 = vector.load %arg6[%c0_46, %c0_47] : memref<1x32xf32, #tpu.memory_space<vmem>>, vector<1x32xf32>
    %93 = vector.broadcast %92 : vector<1x32xf32> to vector<8x32xf32>
    %94 = arith.addf %91, %93 : vector<8x32xf32>
    %c0_48 = arith.constant 0 : index
    %c0_49 = arith.constant 0 : index
    %95 = vector.load %arg1[%c0_48, %c0_49] : memref<8x32xf32, #tpu.memory_space<vmem>>, vector<8x32xf32>
    %96 = arith.addf %94, %95 : vector<8x32xf32>
    %cst_50 = arith.constant dense<0.000000e+00> : vector<8xf32>
    %97 = vector.multi_reduction <add>, %96, %cst_50 [1] : vector<8x32xf32> to vector<8xf32>
    %98 = vector.shape_cast %97 : vector<8xf32> to vector<8x1xf32>
    %cst_51 = arith.constant 3.125000e-02 : f32
    %99 = vector.broadcast %cst_51 : f32 to vector<8x1xf32>
    %100 = arith.mulf %98, %99 : vector<8x1xf32>
    %101 = vector.broadcast %100 : vector<8x1xf32> to vector<8x32xf32>
    %102 = arith.subf %96, %101 : vector<8x32xf32>
    %103 = arith.mulf %102, %102 : vector<8x32xf32>
    %cst_52 = arith.constant dense<0.000000e+00> : vector<8xf32>
    %104 = vector.multi_reduction <add>, %103, %cst_52 [1] : vector<8x32xf32> to vector<8xf32>
    %105 = vector.shape_cast %104 : vector<8xf32> to vector<8x1xf32>
    %cst_53 = arith.constant 3.125000e-02 : f32
    %106 = vector.broadcast %cst_53 : f32 to vector<8x1xf32>
    %107 = arith.mulf %105, %106 : vector<8x1xf32>
    %cst_54 = arith.constant 9.99999996E-13 : f32
    %108 = vector.broadcast %cst_54 : f32 to vector<8x1xf32>
    %109 = arith.addf %107, %108 : vector<8x1xf32>
    %110 = math.rsqrt %109 : vector<8x1xf32>
    %111 = vector.broadcast %110 : vector<8x1xf32> to vector<8x32xf32>
    %112 = arith.mulf %102, %111 : vector<8x32xf32>
    %c0_55 = arith.constant 0 : index
    %c0_56 = arith.constant 0 : index
    %113 = vector.load %arg7[%c0_55, %c0_56] : memref<1x32xf32, #tpu.memory_space<vmem>>, vector<1x32xf32>
    %114 = vector.broadcast %113 : vector<1x32xf32> to vector<8x32xf32>
    %115 = arith.mulf %112, %114 : vector<8x32xf32>
    %c0_57 = arith.constant 0 : index
    %c0_58 = arith.constant 0 : index
    %116 = vector.load %arg8[%c0_57, %c0_58] : memref<1x32xf32, #tpu.memory_space<vmem>>, vector<1x32xf32>
    %117 = vector.broadcast %116 : vector<1x32xf32> to vector<8x32xf32>
    %118 = arith.addf %115, %117 : vector<8x32xf32>
    %c0_59 = arith.constant 0 : index
    %c0_60 = arith.constant 0 : index
    %119 = vector.load %arg9[%c0_59, %c0_60] : memref<8x32xf32, #tpu.memory_space<vmem>>, vector<8x32xf32>
    tpu.vector_store %arg9[%c0_59, %c0_60], %118 {strides = array<i32>} : memref<8x32xf32, #tpu.memory_space<vmem>>, vector<8x32xf32>,
    return
  }
  func.func @transform_0(%arg0: i32) -> (i32, i32) {
    %c0_i32 = arith.constant 0 : i32
    %c0_i32_0 = arith.constant 0 : i32
    return %arg0, %c0_i32 : i32, i32
  }
  func.func @transform_1(%arg0: i32) -> (i32, i32, i32) {
    %c0_i32 = arith.constant 0 : i32
    %c0_i32_0 = arith.constant 0 : i32
    %c0_i32_1 = arith.constant 0 : i32
    return %arg0, %c0_i32, %c0_i32_0 : i32, i32, i32
  }
  func.func @transform_2(%arg0: i32) -> (i32, i32) {
    %c0_i32 = arith.constant 0 : i32
    %c0_i32_0 = arith.constant 0 : i32
    %c0_i32_1 = arith.constant 0 : i32
    return %c0_i32, %c0_i32_0 : i32, i32
  }
  func.func @transform_3(%arg0: i32) -> (i32, i32) {
    %c0_i32 = arith.constant 0 : i32
    %c0_i32_0 = arith.constant 0 : i32
    %c0_i32_1 = arith.constant 0 : i32
    return %c0_i32, %c0_i32_0 : i32, i32
  }
  func.func @transform_4(%arg0: i32) -> (i32, i32) {
    %c0_i32 = arith.constant 0 : i32
    %c0_i32_0 = arith.constant 0 : i32
    %c0_i32_1 = arith.constant 0 : i32
    return %c0_i32, %c0_i32_0 : i32, i32
  }
  func.func @transform_5(%arg0: i32) -> (i32, i32) {
    %c0_i32 = arith.constant 0 : i32
    %c0_i32_0 = arith.constant 0 : i32
    %c0_i32_1 = arith.constant 0 : i32
    return %c0_i32, %c0_i32_0 : i32, i32
  }
  func.func @transform_6(%arg0: i32) -> (i32, i32) {
    %c0_i32 = arith.constant 0 : i32
    %c0_i32_0 = arith.constant 0 : i32
    %c0_i32_1 = arith.constant 0 : i32
    return %c0_i32, %c0_i32_0 : i32, i32
  }
  func.func @transform_7(%arg0: i32) -> (i32, i32) {
    %c0_i32 = arith.constant 0 : i32
    %c0_i32_0 = arith.constant 0 : i32
    %c0_i32_1 = arith.constant 0 : i32
    return %c0_i32, %c0_i32_0 : i32, i32
  }
  func.func @transform_8(%arg0: i32) -> (i32, i32) {
    %c0_i32 = arith.constant 0 : i32
    %c0_i32_0 = arith.constant 0 : i32
    return %arg0, %c0_i32 : i32, i32
  }
}

</mosaic_0001>

<bundles_post_ra>
// kernel: tpu_custom_call.1
= control target key start
LH: loop header
LB: loop body
LE: loop exit
PB: predicated region body
PF: predicated region fallthrough
CT: control target
= control target key end

     0   :  { %s1572_s0 = inlined_call_operand.hbm [shape: f32[16,32], index: 0, kind: input, shape index: {}]   ;;  %s1573_s1 = inlined_call_operand.hbm [shape: f32[2,1,8], index: 1, kind: input, shape index: {}]   ;;  %s1574_s2 = inlined_call_operand.hbm [shape: bf16[32,96], index: 2, kind: input, shape index: {}]   ;;  %s1575_s3 = inlined_call_operand.vmem [shape: f32[1,96], index: 3, kind: input, shape index: {}]   ;;  %s1576_s4 = inlined_call_operand.hbm [shape: bf16[32,32], index: 4, kind: input, shape index: {}]   ;;  %s1577_s5 = inlined_call_operand.vmem [shape: f32[1,32], index: 5, kind: input, shape index: {}]   ;;  %s1578_s6 = inlined_call_operand.vmem [shape: f32[1,32], index: 6, kind: input, shape index: {}]   ;;  %s1579_s7 = inlined_call_operand.vmem [shape: f32[1,32], index: 7, kind: input, shape index: {}]   ;;  %s1580_s8 = inlined_call_operand.hbm [shape: f32[16,32], index: 8, kind: output, shape index: {}]  }
   0x1   :  { %1585 = sst [smem:[#allocation22_spill]] %s1574_s2 }
   0x2   :  { %1586 = sst [smem:[#allocation23_spill]] %s1576_s4 }
   0x3   :  { %13 = vsyncpa [#allocation5], 0 }
   0x4   :  { %15 = vsyncpa [#allocation5 + $0x1], 0 }
   0x5   :  { %16 = vsyncpa [#allocation8], 0 }
   0x6   :  { %18 = vsyncpa [#allocation8 + $0x1], 0 }
   0x7   :  { %19 = vsyncpa [#allocation11], 0 }
   0x8   :  { %20 = vsyncpa [#allocation6], 0 }
   0x9   :  { %22 = vsyncpa [#allocation6 + $0x1], 0  ;;  %s1325_s27 = smov 0   ;;  %s1327_s28 = smov 0  }
   0xa   :  { %s1329_s29 = smov 0   ;;  %s1331_s30 = smov 0  }
   0xb LB: > { %1587 = sst [smem:[#allocation18_spill]] %s1256_s29  ;;  %s1349_s12 = sadd.s32 4294967295, %s1260_s30   ;;  %s1260_s30 = sphi %s1331_s30, %s1601_s30   ;;  %s1256_s29 = sphi %s1329_s29, %s1603_s29   ;;  %s1252_s28 = sphi %s1327_s28, %s1605_s28   ;;  %s1248_s27 = sphi %s1325_s27, %s1604_s27  }
   0xc   : > { %s1588_s2 = sld [smem:[#allocation22_spill]]  ;;  %p906_p0 = scmp.ge.s32.totalorder %s1260_s30, 1 }
   0xd   : > { %p49_p1 = scmp.eq.s32.totalorder %s1349_s12, 0  ;;  %p237_p2 = scmp.lt.s32.totalorder %s1260_s30, 3 }
   0xe   : > { %s1262_s14 = smov [#allocation9]   ;;  %s1590_s4 = sld [smem:[#allocation23_spill]] }
   0xf   : > { %p1354_p3 = pnand %p906_p0, %p237_p2  ;;  %s250_s15 = sshll.u32 %s1262_s14, 4  ;;  %s251_s15 = int_to_ptr.vmem [resolvable:$true] %s250_s15 }
  0x10   : > { %s1263_s19 = smov [#allocation10]   ;;  %s1264_s21 = smov 64  }
  0x11   : > { %p965_p4 = pneg %p1354_p3  ;;  %s267_s20 = sshll.u32 %s1263_s19, 4  ;;  %s268_s20 = int_to_ptr.vmem [resolvable:$true] %s267_s20 }
  0x12   : > { %s248_s11 = sshll.u32 %s1588_s2, 4  ;;  %s1265_s22 = smov 4   ;;  %s249_s11 = int_to_ptr.hbm [resolvable:$true] %s248_s11 }
  0x13   : > { %p966_p6 = pnand %p965_p4, %p49_p1  ;;  %s905_s23 = sadd.s32 4294967294, %s1260_s30  }
  0x14   : > { %s265_s18 = sshll.u32 %s1590_s4, 4  ;;  %s1368_s24 = sadd.s32 1, %s1260_s30   ;;  %s266_s18 = int_to_ptr.hbm [resolvable:$true] %s265_s18 }
  0x15   : > { %968 = dma.hbm_to_vmem [thread:$0]  (!%p966_p6), %s249_s11, 256, %s251_s15, [#allocation8], %s1264_s21, %s1264_s21, %s1265_s22  }
  0x16   : > { %971 = dma.hbm_to_vmem [thread:$0]  (!%p966_p6), %s266_s18, 256, %s268_s20, [#allocation11], %s1264_s21, %s1264_s21, %s1265_s22  }
  0x17   : > { %1591 = sst [smem:[#allocation19_spill]] %s1368_s24  ;;  %s32_s25 = ssub.s32 %s1260_s30, %s1368_s24 }
  0x18   : > { %s35_s26 = sadd.s32 1, %s1256_s29  ;;  %p33_p7 = scmp.eq.s32.totalorder %s32_s25, 0 }
  0x19   : > { %p42_p8 = scmp.ne.s32.totalorder %s1256_s29, %s1252_s28  ;;  %p43_p9 = scmp.eq.s32.totalorder %s1260_s30, 0 }
  0x1a   : > { %p48_p10 = scmp.ne.s32.totalorder %s1252_s28, %s1248_s27  ;;  %p224_p13 = scmp.eq.s32.totalorder %s1349_s12, 1 }
  0x1b   : > { %s1379_s9 = scalar_select %p33_p7, %s1256_s29, %s35_s26  }
  0x1c   : > { %p1381_p11 = por %p43_p9, %p42_p8  ;;  %p1387_p12 = por %p49_p1, %p48_p10 }
  0x1d   : > { %1592 = sst [smem:[#allocation20_spill]] %s1379_s9  ;;  %p230_p0 = scmp.eq.s32.totalorder %s905_s23, 1 }
  0x1e   : > { %p985_p2 = scmp.lt.s32.totalorder %s1260_s30, 2  ;;  %s1394_s14 = sand.u32 1, %s1256_s29  }
  0x1f   : > { %p1396_p4 = por %p224_p13, %p42_p8  ;;  %p1400_p6 = por %p230_p0, %p48_p10 }
  0x20   : > { %s910_s17 = sshll.u32 %s1394_s14, 3  ;;  %s911_s18 = sshll.u32 %s1260_s30, 3 }
  0x21   : > { %s1596_s16 = scalar_select %p1400_p6, 1, 0 }
  0x22   : > { %s298_s21 = scalar_lea.hbm %s1572_s0, %s911_s18  ;;  %s294_s22 = scalar_lea.vmem [#allocation4], %s910_s17 }
  0x23   : > { %1597 = sst [smem:[#allocation21_spill]] %s1596_s16  ;;  %s302_s23 = sshll.u32 %s294_s22, 4  ;;  %s303_s23 = int_to_ptr.vmem [resolvable:$true] %s302_s23 }
  0x24   : > { %s300_s25 = sshll.u32 %s298_s21, 4  ;;  %p1411_p7 = pnand %p985_p2, %p1381_p11  ;;  %s301_s25 = int_to_ptr.hbm [resolvable:$true] %s300_s25 }
  0x25   : > { %s309_s2 = sand.u32 1, %s1260_s30   ;;  %s291_s4 = scalar_lea.sflag [#allocation5], %s1394_s14 }
  0x26   : > { %s1122_s9 = sshra.s32 %s301_s25, 4  ;;  %p1126_p9 = pneg %p1411_p7  ;;  %s1123_s9 = int_to_ptr.hbm [resolvable:$true] %s1122_s9 }
  0x27   : > { %s1124_s29 = scalar_lea.hbm %s1123_s9, 8  ;;  %s1129_s18 = scalar_lea.hbm %s1572_s0, 16 }
  0x28   : > { %p1125_p8 = scmp.ne.s32.totalorder %s1123_s9, %s1124_s29  ;;  %p1130_p11 = scmp.lt.s32.totalorder %s1123_s9, %s1572_s0 }
  0x29   : > { %p1131_p0 = scmp.lt.s32.totalorder %s1129_s18, %s1124_s29 }
  0x2a   : > { %p1127_p10 = pnand %p1126_p9, %p1125_p8 }
  0x2b   : > { %p1132_p2 = por %p1131_p0, %p1130_p11 }
  0x2c   : > { %p1128_p13 = pneg %p1127_p10 }
  0x2e   : > { %p1133_p5 = pnand %p1132_p2, %p1128_p13 }
  0x30   : > { %1136 = shalt.err (!%p1133_p5)
}
  0x31   : > { %975 = dma.hbm_to_vmem [thread:$0]  (!%p1411_p7), %s301_s25, 128, %s303_s23, %s291_s4  }
  0x32   : > { %s315_s24 = scalar_lea.hbm %s1573_s1, %s1260_s30  ;;  %s312_s17 = scalar_lea.vmem [#allocation7], %s1394_s14 }
  0x33   : > { %s319_s10 = sshll.u32 %s312_s17, 4  ;;  %s317_s16 = sshll.u32 %s315_s24, 4  ;;  %s320_s10 = int_to_ptr.vmem [resolvable:$true] %s319_s10  ;;  %s318_s16 = int_to_ptr.hbm [resolvable:$true] %s317_s16 }
  0x34   : > { %s310_s9 = scalar_lea.sflag [#allocation8], %s309_s2  ;;  %s1152_s29 = sshra.s32 %s318_s16, 4  ;;  %s1153_s29 = int_to_ptr.hbm [resolvable:$true] %s1152_s29 }
  0x35   : > { %s1154_s18 = scalar_lea.hbm %s1153_s29, 1  ;;  %s1159_s23 = scalar_lea.hbm %s1573_s1, 2 }
  0x36   : > { %p1155_p5 = scmp.ne.s32.totalorder %s1153_s29, %s1154_s18  ;;  %p1160_p13 = scmp.lt.s32.totalorder %s1153_s29, %s1573_s1 }
  0x37   : > { %p1161_p11 = scmp.lt.s32.totalorder %s1159_s23, %s1154_s18 }
  0x38   : > { %p1157_p8 = pnand %p1155_p5, %p1126_p9 }
  0x39   : > { %p1162_p0 = por %p1161_p11, %p1160_p13 }
  0x3a   : > { %p1158_p10 = pneg %p1157_p8 }
  0x3c   : > { %p1163_p2 = pnand %p1162_p0, %p1158_p10 }
  0x3e   : > { %1166 = shalt.err (!%p1163_p2)
}
  0x3f   : > { %978 = dma.hbm_to_vmem [thread:$0]  (!%p1411_p7), %s318_s16, 16, %s320_s10, %s310_s9  }
  0x40   : > { %328 = sbr.rel (%p1354_p3) target bundleno = 1445 (0x5a5), region = 52  ;;  %s1449_s2 = sand.u32 (!%p1354_p3), 1, %s1252_s28  }
  0x41   : > { %s913_s24 = sshll.u32 (!%p1354_p3), %s1449_s2, 3  ;;  %s331_s14 = scalar_lea.sflag (!%p1354_p3), [#allocation5], %s1449_s2 }
  0x42   : > { %s334_s21 = scalar_lea.vmem (!%p1354_p3), [#allocation4], %s913_s24 }
  0x45   : > { %1227 = dma.done.wait (%p1387_p12), %s331_s14, 128  }
  0x46   : > { %1229 = vsyncadd (%p1387_p12), %s331_s14, 4294967168  ;;  %s340_s13 = sand.u32 1, %s1349_s12   ;;  %s343_s26 = scalar_lea.vmem [#allocation7], %s1449_s2 }
  0x47   : > { %s341_s16 = scalar_lea.sflag [#allocation8], %s340_s13 }
  0x48   : > { %1231 = dma.done.wait (%p1387_p12), %s341_s16, 16  }
  0x49   : > { %1233 = vsyncadd (%p1387_p12), %s341_s16, 4294967280 }
  0x4a   : > { %1235 = dma.done.wait (%p49_p1), [#allocation8], 256  }
  0x4b   : > { %1237 = vsyncadd (%p49_p1), [#allocation8], 4294967040 }
  0x4c   : > { %1239 = dma.done.wait (%p49_p1), [#allocation11], 256  }
  0x4d   : > { %1241 = vsyncadd (%p49_p1), [#allocation11], 4294967040  ;;  %v948_v0 = vld [vmem:[#allocation9 + $0x8] sm:$0xff]  ;;  %v947_v1 = vld [vmem:[#allocation9] sm:$0xff]  ;;  %vm414_vm0 = vcmask 261120   ;;  %vm432_vm1 = vcmask 781312  }
  0x4e   : > { %v1473_v2 = vld [vmem:[%s334_s21] sm:$0xff]  ;;  %424 = vmatpush.bf16.msra.mxu0 %v948_v0  ;;  %v1039_v4 = vld [vmem:[%s1575_s3] ss:$0 sm:$0xff]  ;;  %s1266_s17 = smov 104   ;;  %s1267_s10 = smov 120   ;;  %vm444_vm2 = vcmask 64512  }
  0x4f   : > { %v393_v3 = vpack.c.bf16 %v1473_v2, %v1473_v2  ;;  %s1268_s9 = smov 96   ;;  %s1269_s29 = smov 80   ;;  %v1040_v32 = vld [vmem:[%s343_s26] ss:$0 sm:$0xff]  ;;  %vm481_vm3 = vcmask 1043456   ;;  %vm700_vm4 = vcmask 130048  }
  0x50   : > { %s1270_s18 = smov 72   ;;  %s1271_s19 = smov 88   ;;  %vm703_vm5 = vcmask 195584   ;;  %vm707_vm6 = vcmask 257024  }
  0x51   : > { %s1272_s4 = smov 112   ;;  %s1273_s23 = smov 64  }
  0x52   : > { %425 = vmatpush.bf16.msra.mxu0 %v947_v1  ;;  %s1274_s25 = smov 40   ;;  %s1275_s20 = smov 56  }
  0x53   : > { %s1276_s14 = smov 48   ;;  %s1277_s21 = smov 8  }
  0x54   : > { %s1278_s13 = smov 16   ;;  %s1279_s16 = smov 24  }
  0x55   : > { %925 = vmatmul.msk.bf16.vlgmr.msra.gmra.mxu0 %vm414_vm0, %v393_v3  ;;  %s944_s22 = sshll.u32 %s1349_s12, 3  ;;  %s390_s12 = scalar_lea.vmem [#allocation12], %s913_s24 }
  0x56   : > { %s1202_s24 = scalar_lea.hbm %s1580_s8, 16 }
  0xd2   : > { %v427_v5 = vpop.f32.mrf.mxu0 }
  0xd3   : > { %v428_v6 = vadd.f32 %v1039_v4, %v427_v5 }
  0xd5   : > { %v431_v7 = vpack.c.bf16 %v428_v6, %v428_v6 }
  0xd7   : > { %433 = vst.msk [vmem:[#allocation2] sm:$0xf] %vm432_vm1, %v431_v7 }
  0xda   : > { %v429_v8 = vpop.f32.mrf.mxu0 }
  0xde   : > { %v621_v9 = vld [vmem:[#allocation2] sm:$0xf] }
  0xdf   : > { %v499_v10 = vld [vmem:[#allocation2] sm:$0xf]  ;;  %v623_v12 = vunpack.c.l.b16 %v621_v9 }
  0xe0   : > { %v435_v11 = vld [vmem:[#allocation2] sm:$0xf]  ;;  %v501_v13 = vunpack.c.l.b16 %v499_v10 }
  0xe1   : > { %v440_v14 = vunpack.c.l.b16 %v435_v11  ;;  %v1481_v15 = vpack.c.b16 %v623_v12, %v623_v12  ;;  %v560_v18 = vld [vmem:[#allocation2] sm:$0xf] }
  0xe2   : > { %v1483_v16 = vpack.c.b16 %v501_v13, %v501_v13  ;;  %v562_v19 = vunpack.c.l.b16 %v560_v18 }
  0xe3   : > { %v441_v17 = vpack.c.b16 %v440_v14, %v440_v14  ;;  %625 = vrot.lane.b32.xlu2 %v1481_v15, %s1266_s17 }
  0xe4   : > { %503 = vrot.lane.b32.xlu1 %v1483_v16, %s1267_s10  ;;  %v1487_v20 = vpack.c.b16 %v562_v19, %v562_v19 }
  0xe5   : > { %442 = vrot.lane.b32.xlu0 %v441_v17, %s1268_s9 }
  0xeb   : > { %566 = vrot.lane.b32.xlu2 %v1487_v20, %s1269_s29 }
  0xec   : > { %627 = vrot.lane.b32.xlu1 %v1481_v15, %s1270_s18  ;;  %s792_s18 = scalar_lea.hbm %s1580_s8, %s944_s22 }
  0xed   : > { %505 = vrot.lane.b32.xlu0 %v1483_v16, %s1271_s19 }
  0xf5   : > { %564 = vrot.lane.b32.xlu0 %v1487_v20, %s1272_s4 }
 0x13d   : > { %v626_v21 = vpop.permute.xlu2 %625 }
 0x145   : > { %v567_v22 = vpop.permute.xlu2 %566 }
 0x146   : > { %v572_v23 = vsel %vm444_vm2, %v567_v22, 0 }
 0x147   : > { %581 = vmatpush.bf16.xpose.msrb.mxu0 %v572_v23 }
 0x156   : > { %v504_v24 = vpop.permute.xlu1 %503 }
 0x157   : > { %v443_v25 = vpop.permute.xlu0 %442 }
 0x158   : > { %v449_v26 = vsel %vm444_vm2, %v443_v25, 0 }
 0x159   : > { %458 = vmatpush.bf16.xpose.msra.mxu1 %v449_v26 }
 0x15e   : > { %v628_v27 = vpop.permute.xlu1 %627 }
 0x15f   : > { %v506_v28 = vpop.permute.xlu0 %505  ;;  %v633_v29 = vsel %vm444_vm2, %v628_v27, 0 }
 0x160   : > { %926 = vmatmul.msk.bf16.vlgmr.msra.gmra.mxu1 %vm444_vm2, %v435_v11  ;;  %v511_v30 = vsel %vm444_vm2, %v506_v28, 0 }
 0x161   : > { %520 = vmatpush.bf16.xpose.msra.mxu3 %v511_v30 }
 0x167   : > { %v565_v31 = vpop.permute.xlu0 %564 }
 0x168   : > { %928 = vmatmul.msk.bf16.vlgmr.msra.gmra.mxu3 %vm444_vm2, %v504_v24  ;;  %930 = vmatmul.msk.bf16.vlgmr.msrb.gmra.mxu0 %vm444_vm2, %v565_v31 }
 0x169   : > { %642 = vmatpush.bf16.xpose.msrb.mxu3 %v633_v29 }
 0x178   : > { %932 = vmatmul.msk.bf16.vlgmr.msrb.gmra.mxu3 %vm444_vm2, %v626_v21 }
 0x1dd   : > { %v460_v33 = vpop.f32.mrf.mxu1 }
 0x1de   : > { %v461_v34 = vadd.f32 %v1040_v32, %v460_v33 }
 0x1e0   : > { %v464_v35 = vsel %vm444_vm2, %v461_v34, -inf }
 0x1e1   : > { %465 = vmax.xlane.f32.xlu1 %v464_v35 }
 0x1e5   : > { %v462_v36 = vpop.f32.mrf.mxu1  ;;  %v583_v37 = vpop.f32.mrf.mxu0 }
 0x1e6   : > { %v584_v42 = vadd.f32 %v1040_v32, %v583_v37 }
 0x1e8   : > { %v587_v44 = vsel %vm444_vm2, %v584_v42, -inf }
 0x1eb   : > { %v522_v38 = vpop.f32.mrf.mxu3 }
 0x1ec   : > { %v523_v39 = vadd.f32 %v1040_v32, %v522_v38 }
 0x1ed   : > { %v585_v40 = vpop.f32.mrf.mxu0 }
 0x1ee   : > { %v526_v41 = vsel %vm444_vm2, %v523_v39, -inf }
 0x1ef   : > { %527 = vmax.xlane.f32.xlu2 %v526_v41 }
 0x1f3   : > { %v524_v43 = vpop.f32.mrf.mxu3 }
 0x1f7   : > { %588 = vmax.xlane.f32.xlu2 %v587_v44 }
 0x1fb   : > { %v644_v45 = vpop.f32.mrf.mxu3 }
 0x1fc   : > { %v645_v46 = vadd.f32 %v1040_v32, %v644_v45 }
 0x1fe   : > { %v648_v47 = vsel %vm444_vm2, %v645_v46, -inf }
 0x1ff   : > { %649 = vmax.xlane.f32.xlu0 %v648_v47  ;;  %v950_v47 = vld [vmem:[#allocation10 + $0x8] sm:$0xff] }
 0x200   : > { %739 = vmatpush.bf16.msra.mxu0 %v950_v47 }
 0x203   : > { %v646_v48 = vpop.f32.mrf.mxu3 }
 0x204   : > { %v949_v48 = vld [vmem:[#allocation10] sm:$0xff] }
 0x205   : > { %740 = vmatpush.bf16.msra.mxu0 %v949_v48 }
 0x20f   : > { %476 = vrot.lane.b32.xlu2 %v441_v17, %s1273_s23  ;;  %s794_s23 = sshll.u32 %s390_s12, 4  ;;  %s795_s23 = int_to_ptr.vmem [resolvable:$true] %s794_s23 }
 0x217   : > { %660 = vrot.lane.b32.xlu2 %v1481_v15, %s1274_s25  ;;  %s796_s25 = sshll.u32 %s792_s18, 4  ;;  %s797_s25 = int_to_ptr.hbm [resolvable:$true] %s796_s25 }
 0x254   : > { %v466_v49 = vpop.xlane.xlu1 %465 }
 0x255   : > { %v467_v50 = vsub.f32 %v461_v34, %v466_v49 }
 0x257   : > { %v468_v51 = vmul.f32 1.442695, %v467_v50 }
 0x259   : > { %1044 = vpow2.f32 %v468_v51 }
 0x25f   : > { %v1045_v52 = vpop.eup %1044 }
 0x260   : > { %v470_v53 = vsel %vm444_vm2, %v1045_v52, 0.0 }
 0x261   : > { %471 = vadd.xlane.f32.xlu1 %v470_v53 }
 0x262   : > { %v528_v54 = vpop.xlane.xlu2 %527 }
 0x263   : > { %v529_v57 = vsub.f32 %v523_v39, %v528_v54 }
 0x265   : > { %v530_v59 = vmul.f32 1.442695, %v529_v57  ;;  %v1041_v57 = vld [vmem:[%s1577_s5] ss:$0 sm:$0xff] }
 0x26a   : > { %v589_v55 = vpop.xlane.xlu2 %588 }
 0x26b   : > { %v590_v56 = vsub.f32 %v584_v42, %v589_v55 }
 0x26d   : > { %v591_v58 = vmul.f32 1.442695, %v590_v56 }
 0x26f   : > { %1046 = vpow2.f32 %v591_v58 }
 0x270   : > { %1048 = vpow2.f32 %v530_v59 }
 0x272   : > { %v477_v60 = vpop.permute.xlu2 %476  ;;  %v650_v61 = vpop.xlane.xlu0 %649 }
 0x273   : > { %v483_v62 = vsel %vm481_vm3, %v477_v60, 0  ;;  %v651_v0 = vsub.f32 %v645_v46, %v650_v61 }
 0x274   : > { %492 = vmatpush.bf16.msra.mxu2 %v483_v62 }
 0x275   : > { %v1047_v63 = vpop.eup %1046  ;;  %v652_v3 = vmul.f32 1.442695, %v651_v0 }
 0x276   : > { %v593_v1 = vsel %vm444_vm2, %v1047_v63, 0.0  ;;  %v1049_v4 = vpop.eup %1048 }
 0x277   : > { %594 = vadd.xlane.f32.xlu0 %v593_v1  ;;  %1050 = vpow2.f32 %v652_v3  ;;  %v532_v5 = vsel %vm444_vm2, %v1049_v4, 0.0 }
 0x27a   : > { %538 = vrot.lane.b32.xlu1 %v1483_v16, %s1275_s20  ;;  %v661_v13 = vpop.permute.xlu2 %660  ;;  %s782_s20 = scalar_lea.sflag [#allocation6], %s1449_s2 }
 0x27b   : > { %v666_v16 = vsel %vm481_vm3, %v661_v13, 0  ;;  %v1042_v13 = vld [vmem:[%s1578_s6] ss:$0 sm:$0xff] }
 0x27d   : > { %v1051_v6 = vpop.eup %1050 }
 0x27e   : > { %v654_v7 = vsel %vm444_vm2, %v1051_v6, 0.0 }
 0x27f   : > { %533 = vadd.xlane.f32.xlu0 %v532_v5 }
 0x287   : > { %655 = vadd.xlane.f32.xlu0 %v654_v7 }
 0x29b   : > { %599 = vrot.lane.b32.xlu0 %v1487_v20, %s1276_s14  ;;  %s1196_s14 = sshra.s32 %s797_s25, 4  ;;  %s1197_s14 = int_to_ptr.hbm [resolvable:$true] %s1196_s14 }
 0x29c   : > { %p1203_p7 = scmp.lt.s32.totalorder %s1197_s14, %s1580_s8 }
 0x2d4   : > { %v472_v8 = vpop.xlane.xlu1 %471 }
 0x2d5   : > { %1052 = vrcp.f32 %v472_v8 }
 0x2db   : > { %v1053_v9 = vpop.eup %1052 }
 0x2dc   : > { %v474_v10 = vmul.f32 %v1053_v9, %v1045_v52 }
 0x2de   : > { %v475_v11 = vpack.c.bf16 %v474_v10, %v474_v10 }
 0x2e0   : > { %927 = vmatmul.msk.bf16.vlgmr.msra.gmra.mxu2 %vm444_vm2, %v475_v11 }
 0x2ea   : > { %v595_v12 = vpop.xlane.xlu0 %594 }
 0x2ec   : > { %v539_v14 = vpop.permute.xlu1 %538 }
 0x2ed   : > { %v544_v15 = vsel %vm481_vm3, %v539_v14, 0 }
 0x2ee   : > { %553 = vmatpush.bf16.msrb.mxu2 %v544_v15  ;;  %v1043_v15 = vld [vmem:[%s1579_s7] ss:$0 sm:$0xff] }
 0x2f2   : > { %675 = vmatpush.bf16.msra.mxu2 %v666_v16  ;;  %v534_v17 = vpop.xlane.xlu0 %533 }
 0x2f3   : > { %1054 = vrcp.f32 %v534_v17 }
 0x2f9   : > { %v1055_v18 = vpop.eup %1054 }
 0x2fa   : > { %v536_v19 = vmul.f32 %v1055_v18, %v1049_v4  ;;  %v656_v20 = vpop.xlane.xlu0 %655 }
 0x2fb   : > { %1056 = vrcp.f32 %v656_v20 }
 0x2fc   : > { %v537_v21 = vpack.c.bf16 %v536_v19, %v536_v19  ;;  %1058 = vrcp.f32 %v595_v12 }
 0x2fe   : > { %929 = vmatmul.msk.bf16.vlgmr.msrb.gmra.mxu2 %vm444_vm2, %v537_v21 }
 0x301   : > { %v1057_v22 = vpop.eup %1056 }
 0x302   : > { %v658_v23 = vmul.f32 %v1057_v22, %v1051_v6  ;;  %v1059_v24 = vpop.eup %1058 }
 0x303   : > { %v597_v25 = vmul.f32 %v1059_v24, %v1047_v63 }
 0x304   : > { %v659_v26 = vpack.c.bf16 %v658_v23, %v658_v23 }
 0x305   : > { %v598_v29 = vpack.c.bf16 %v597_v25, %v597_v25 }
 0x30d   : > { %v600_v27 = vpop.permute.xlu0 %599 }
 0x30e   : > { %933 = vmatmul.msk.bf16.vlgmr.msra.gmra.mxu2 %vm444_vm2, %v659_v26  ;;  %v605_v28 = vsel %vm481_vm3, %v600_v27, 0 }
 0x30f   : > { %614 = vmatpush.bf16.msrb.mxu1 %v605_v28 }
 0x312   : > { %931 = vmatmul.msk.bf16.vlgmr.msrb.gmra.mxu1 %vm444_vm2, %v598_v29 }
 0x363   : > { %v494_v30 = vpop.f32.mrf.mxu2 }
 0x364   : > { %v498_v50 = vpack.c.bf16 %v494_v30, %v494_v30 }
 0x36b   : > { %v496_v31 = vpop.f32.mrf.mxu2 }
 0x381   : > { %v555_v32 = vpop.f32.mrf.mxu2 }
 0x382   : > { %v559_v33 = vpack.c.bf16 %v555_v32, %v555_v32 }
 0x384   : > { %v683_v34 = vunpack.c.l.b16 %v559_v33 }
 0x386   : > { %v684_v35 = vpack.c.b16 %v683_v34, %v683_v34 }
 0x388   : > { %685 = vrot.lane.b32.xlu1 %v684_v35, %s1277_s21  ;;  %s1198_s21 = scalar_lea.hbm %s1197_s14, 8 }
 0x389   : > { %v557_v36 = vpop.f32.mrf.mxu2  ;;  %p1199_p1 = scmp.ne.s32.totalorder %s1197_s14, %s1198_s21  ;;  %p1204_p9 = scmp.lt.s32.totalorder %s1202_s24, %s1198_s21 }
 0x38b   : > { %p1200_p3 = pnand %p1199_p1, %p1396_p4  ;;  %p1205_p5 = por %p1204_p9, %p1203_p7 }
 0x38d   : > { %p1201_p12 = pneg %p1200_p3 }
 0x38f   : > { %v616_v37 = vpop.f32.mrf.mxu1  ;;  %p1206_p8 = pnand %p1205_p5, %p1201_p12 }
 0x390   : > { %v620_v38 = vpack.c.bf16 %v616_v37, %v616_v37 }
 0x391   : > { %v677_v39 = vpop.f32.mrf.mxu2 }
 0x392   : > { %v688_v40 = vunpack.c.l.b16 %v620_v38  ;;  %v681_v41 = vpack.c.bf16 %v677_v39, %v677_v39 }
 0x394   : > { %v689_v42 = vpack.c.b16 %v688_v40, %v688_v40  ;;  %v693_v43 = vunpack.c.l.b16 %v681_v41 }
 0x396   : > { %v694_v44 = vpack.c.b16 %v693_v43, %v693_v43  ;;  %690 = vrot.lane.b32.xlu2 %v689_v42, %s1278_s13 }
 0x397   : > { %v618_v45 = vpop.f32.mrf.mxu1 }
 0x398   : > { %695 = vrot.lane.b32.xlu1 %v694_v44, %s1279_s16 }
 0x399   : > { %v679_v46 = vpop.f32.mrf.mxu2 }
 0x3f0   : > { %v691_v52 = vpop.permute.xlu2 %690 }
 0x3fa   : > { %v686_v49 = vpop.permute.xlu1 %685 }
 0x3fb   : > { %v699_v51 = vsel %vm444_vm2, %v498_v50, %v686_v49 }
 0x3fc   : > { %v702_v54 = vsel %vm700_vm4, %v699_v51, %v691_v52 }
 0x40a   : > { %v696_v53 = vpop.permute.xlu1 %695 }
 0x40b   : > { %v705_v55 = vsel %vm703_vm5, %v702_v54, %v696_v53 }
 0x40c   : > { %708 = vst.msk [vmem:[#allocation3] sm:$0xf] %vm707_vm6, %v705_v55 }
 0x413   : > { %v709_v56 = vld [vmem:[#allocation3] sm:$0xf] }
 0x414   : > { %942 = vmatmul.msk.bf16.vlgmr.msra.gmra.mxu0 %vm414_vm0, %v709_v56 }
 0x491   : > { %v742_v58 = vpop.f32.mrf.mxu0 }
 0x492   : > { %v743_v59 = vadd.f32 %v1041_v57, %v742_v58 }
 0x494   : > { %v747_v60 = vadd.f32 %v743_v59, %v1473_v2 }
 0x496   : > { %v748_v61 = vsel %vm414_vm0, %v747_v60, 0.0 }
 0x497   : > { %749 = vadd.xlane.f32.xlu2 %v748_v61 }
 0x499   : > { %v744_v62 = vpop.f32.mrf.mxu0 }
 0x50a   : > { %v750_v63 = vpop.xlane.xlu2 %749 }
 0x50b   : > { %v751_v0 = vmul.f32 0.03125, %v750_v63 }
 0x50d   : > { %v752_v1 = vsub.f32 %v747_v60, %v751_v0 }
 0x50f   : > { %v753_v3 = vmul.f32 %v752_v1, %v752_v1 }
 0x511   : > { %v754_v4 = vsel %vm414_vm0, %v753_v3, 0.0 }
 0x512   : > { %755 = vadd.xlane.f32.xlu1 %v754_v4 }
 0x585   : > { %v756_v5 = vpop.xlane.xlu1 %755 }
 0x586   : > { %v757_v6 = vmul.f32 0.03125, %v756_v5 }
 0x588   : > { %v758_v7 = vadd.f32 1e-12, %v757_v6 }
 0x58a   : > { %1060 = vrsqrt.f32 %v758_v7  ;;  %vm765_vm8 = vweird.f32 %v758_v7 }
 0x590   : > { %v1061_v8 = vpop.eup %1060 }
 0x591   : > { %v760_v9 = vmul.f32 %v1061_v8, %v758_v7  ;;  %vm766_vm7 = vweird.f32 %v1061_v8 }
 0x592   : > { %vm767_vm9 = vmor %vm765_vm8, %vm766_vm7 }
 0x593   : > { %v761_v2 = vmul.f32 %v1061_v8, %v760_v9 }
 0x595   : > { %v762_v10 = vmul.f32 0.5, %v761_v2 }
 0x597   : > { %v763_v11 = vsub.f32 1.5, %v762_v10 }
 0x599   : > { %v764_v12 = vmul.f32 %v1061_v8, %v763_v11 }
 0x59b   : > { %v768_v14 = vsel %vm767_vm9, %v1061_v8, %v764_v12 }
 0x59c   : > { %v769_v16 = vmul.f32 %v768_v14, %v752_v1 }
 0x59e   : > { %v774_v17 = vmul.f32 %v1042_v13, %v769_v16 }
 0x5a0   : > { %v779_v18 = vadd.f32 %v1043_v15, %v774_v17 }
 0x5a2   : > { %780 = vst.msk [vmem:[%s390_s12] sm:$0xff] %vm414_vm0, %v779_v18 }
 0x5a3   : > { %1209 = shalt.err (!%p1206_p8)
}
 0x5a4   : > { %963 = dma.vmem_to_hbm [thread:$0]  (%p1396_p4), %s795_s23, 128, %s797_s25, %s782_s20  }
 0x5a5 PF: > { %s808_s22 = sand.u32 1, %s1248_s27   ;;  %p1600_p10 = scmp.ge.s32.totalorder %s1260_s30, 2 }
 0x5a6   : > { %s809_s17 = scalar_lea.sflag [#allocation6], %s808_s22 }
 0x5a7   : > { %p980_p13 = pnand %p1600_p10, %p1400_p6 }
 0x5a9   : > { %p981_p11 = pneg %p980_p13 }
 0x5ab   : > { %1243 = dma.done.wait (%p981_p11), %s809_s17, 128  }
 0x5ac   : > { %1245 = vsyncadd (%p981_p11), %s809_s17, 4294967168  ;;  %s1601_s30 = sld [smem:[#allocation19_spill]]  ;;  %s1604_s27 = smov %s1252_s28 }
 0x5ad   : > { %s1602_s10 = sld [smem:[#allocation18_spill]] }
 0x5ae   : > { %s1603_s29 = sld [smem:[#allocation20_spill]] }
 0x5b2   : > { %p25_p0 = scmp.ge.s32.totalorder %s1601_s30, 4  }
 0x5b3   : > { %s1605_s28 = smov %s1602_s10 }
 0x5b4   :  { %27 = sbr.rel (!%p25_p0) target bundleno = 11 (0xb), region = 118 }
 0x5b9   :  { %815 = vsyncpa [#allocation5], 1 }
 0x5ba   :  { %817 = vsyncpa [#allocation5 + $0x1], 1 }
 0x5bb   :  { %818 = vsyncpa [#allocation8], 1 }
 0x5bc   :  { %820 = vsyncpa [#allocation8 + $0x1], 1 }
 0x5bd   :  { %821 = vsyncpa [#allocation11], 1 }
 0x5be   :  { %822 = vsyncpa [#allocation6], 1 }
 0x5bf   :  { %824 = vsyncpa [#allocation6 + $0x1], 1 }

</bundles_post_ra>
